<compile_context>
chip_gen: v5e
topology: v5e:2x2
jax: 0.10.0
libtpu: 0.0.40
codegen_flags: <defaults>
</compile_context>

<pallas_src>
import functools

import jax
import jax.numpy as jnp
from jax.experimental import pallas as pl
from jax.experimental.pallas import tpu as pltpu

LANES = 128                     # vreg lane width (last dim)
SUBLANES = 8                    # f32 sublane tile (second-to-last dim)
_TARGET_BLOCK_BYTES = 4 << 20   # ~4 MiB per buffer (review: 2-4 MiB sweet spot)
_VMEM_LIMIT_BYTES = 48 << 20    # above 16/32 MiB scoped defaults, <= 64 MiB (v7x)


def _round_up(v, m):
    return -(-v // m) * m


def _fused_residual_kernel(fn, x_ref, o_ref):
    # out = fn(x) + x, entirely in vregs on the current tile.
    # NOTE: fn must be strictly per-element (activation / scale / gate ...);
    # anything that depends on the original axes or reduces would be wrong here.
    x = x_ref[...]
    o_ref[...] = (fn(x) + x).astype(o_ref.dtype)


def _residual_add_kernel(y_ref, x_ref, o_ref):
    # out = y + x  (y = fn(x) computed outside for non-elementwise fns)
    o_ref[...] = (y_ref[...] + x_ref[...]).astype(o_ref.dtype)


def _run_lane_dense(kernel_body, args, out_dtype):
    """Run an elementwise kernel over same-shaped args in a lane-dense (rows,128) slab."""
    shape = args[0].shape
    n = args[0].size
    itemsize = jnp.dtype(out_dtype).itemsize
    packing = max(1, 4 // itemsize)        # 1 f32, 2 bf16, 4 int8/fp8
    sub = SUBLANES * packing               # dtype-aware sublane tile

    rows = pl.cdiv(n, LANES)
    padded = rows * LANES != n             # ragged tail (< 1 row of padding)

    # Byte-targeted block size, clamped to the array, kept a multiple of the
    # packed sublane tile, and capped so big tensors get >= 2 grid steps
    # (v7x has 2 TensorCores sharing the parallel grid axis).
    block_rows = max(sub, (_TARGET_BLOCK_BYTES // (LANES * itemsize)) // sub * sub)
    block_rows = min(block_rows, _round_up(rows, sub))
    if rows > 2 * sub:
        block_rows = min(block_rows, _round_up(pl.cdiv(rows, 2), sub))
    block_rows = max(sub, block_rows)
    grid = pl.cdiv(rows, block_rows)

    def to_slab(a):
        if padded:
            flat = a.reshape(-1)
            flat = jnp.pad(flat, (0, rows * LANES - n))   # at most 127 elements
            return flat.reshape(rows, LANES)
        return a.reshape(rows, LANES)                     # zero-copy reshape

    slabs = [to_slab(a) for a in args]
    spec = pl.BlockSpec((block_rows, LANES), lambda i: (i, 0))
    bytes_accessed = (len(slabs) + 1) * n * itemsize

    out = pl.pallas_call(
        kernel_body,
        out_shape=jax.ShapeDtypeStruct((rows, LANES), out_dtype),
        grid=(grid,),
        in_specs=[spec] * len(slabs),
        out_specs=spec,
        compiler_params=pltpu.CompilerParams(
            dimension_semantics=("parallel",),
            vmem_limit_bytes=_VMEM_LIMIT_BYTES),
        cost_estimate=pl.CostEstimate(
            flops=n, transcendentals=0, bytes_accessed=bytes_accessed),
    )(*slabs)

    if padded:
        return out.reshape(-1)[:n].reshape(shape)
    return out.reshape(shape)


class Residual:
    """Pallas port of the PyTorch module: forward(x) = fn(x) + x.

    elementwise=True  : fn is strictly per-element; fn(x) + x is fused into one
                        Pallas kernel (one HBM read of x, one HBM write).
    elementwise=False : fn is arbitrary; it runs as plain JAX and the +x is left
                        to XLA so it fuses into fn's epilogue (a standalone
                        Pallas add would force an extra HBM round trip of fn(x)).
                        Set force_pallas_add=True to do the add in Pallas anyway.
    """

    def __init__(self, fn, *, elementwise=False, force_pallas_add=False):
        self.fn = fn
        self.elementwise = elementwise
        self.force_pallas_add = force_pallas_add

    def __call__(self, x):
        if self.elementwise:
            body = functools.partial(_fused_residual_kernel, self.fn)
            return _run_lane_dense(body, [x], x.dtype)
        y = self.fn(x)
        if self.force_pallas_add:
            return _run_lane_dense(_residual_add_kernel, [y, x], x.dtype)
        # TODO(synk): an arbitrary fn submodule cannot be fused into a generic
        # Pallas kernel; per the perf review the residual add is left to XLA so
        # it fuses into fn's epilogue instead of adding an HBM round trip.
        return y + x


if __name__ == "__main__":
    key = jax.random.PRNGKey(0)
    kx, kw, kr = jax.random.split(key, 3)

    N, C, H, W = 2, 4, 16, 16
    x = jax.random.normal(kx, (N, C, H, W), jnp.float32)

    # 1) elementwise fn -> fully fused Pallas kernel (zero-copy lane-dense path)
    act = jax.nn.gelu
    res_fused = Residual(act, elementwise=True)
    out_fused = jax.block_until_ready(res_fused(x))
    ref_fused = act(x) + x
    assert out_fused.shape == x.shape
    assert jnp.allclose(out_fused, ref_fused, atol=1e-4, rtol=1e-4), \
        "fused residual mismatch"

    # 2) ragged numel (not a multiple of 128) -> minimal-pad + masked edge block
    xr = jax.random.normal(kr, (3, 5, 7, 11), jnp.float32)   # 1155 elements
    out_r = jax.block_until_ready(res_fused(xr))
    ref_r = act(xr) + xr
    assert out_r.shape == xr.shape
    assert jnp.allclose(out_r, ref_r, atol=1e-4, rtol=1e-4), \
        "ragged fused residual mismatch"

    # 3) generic fn (channel-mixing einsum) -> fn in plain JAX, +x fused by XLA
    w = 0.1 * jax.random.normal(kw, (C, C), jnp.float32)
    mix = lambda v: jnp.einsum("nchw,cd->ndhw", v, w)
    res_generic = Residual(mix)
    out_generic = jax.block_until_ready(res_generic(x))
    ref_generic = mix(x) + x
    assert out_generic.shape == x.shape
    assert jnp.allclose(out_generic, ref_generic, atol=1e-4, rtol=1e-4), \
        "generic residual mismatch"

    # 3b) same generic fn, residual add forced through the Pallas add kernel
    res_generic_p = Residual(mix, force_pallas_add=True)
    out_generic_p = jax.block_until_ready(res_generic_p(x))
    assert jnp.allclose(out_generic_p, ref_generic, atol=1e-4, rtol=1e-4), \
        "generic (pallas add) residual mismatch"

    print("KERNEL_OK")
</pallas_src>

<mosaic_0001>
module attributes {stable_mosaic.version = 11 : i64} {
  func.func @_fused_residual_kernel(%arg0: i32, %arg1: memref<16x128xf32, #tpu.memory_space<vmem>>, %arg2: memref<16x128xf32, #tpu.memory_space<vmem>>) attributes {dimension_semantics = [#tpu.dimension_semantics<parallel>], iteration_bounds = array<i64: 1>, scalar_prefetch = 0 : i64, scratch_operands = 0 : i64, tpu.core_type = #tpu.core_type<tc>, window_params = [{transform_indices = @transform_0, window_bounds = array<i64: 16, 128>}, {transform_indices = @transform_1, window_bounds = array<i64: 16, 128>}]} {
    %c0 = arith.constant 0 : index
    %c0_0 = arith.constant 0 : index
    %0 = vector.load %arg1[%c0, %c0_0] : memref<16x128xf32, #tpu.memory_space<vmem>>, vector<16x128xf32>
    %1 = arith.mulf %0, %0 : vector<16x128xf32>
    %2 = arith.mulf %0, %1 : vector<16x128xf32>
    %cst = arith.constant 4.471500e-02 : f32
    %3 = vector.broadcast %cst : f32 to vector<16x128xf32>
    %4 = arith.mulf %3, %2 : vector<16x128xf32>
    %5 = arith.addf %0, %4 : vector<16x128xf32>
    %cst_1 = arith.constant 0.797884583 : f32
    %6 = vector.broadcast %cst_1 : f32 to vector<16x128xf32>
    %7 = arith.mulf %6, %5 : vector<16x128xf32>
    %8 = math.tanh %7 : vector<16x128xf32>
    %cst_2 = arith.constant 1.000000e+00 : f32
    %9 = vector.broadcast %cst_2 : f32 to vector<16x128xf32>
    %10 = arith.addf %9, %8 : vector<16x128xf32>
    %cst_3 = arith.constant 5.000000e-01 : f32
    %11 = vector.broadcast %cst_3 : f32 to vector<16x128xf32>
    %12 = arith.mulf %11, %10 : vector<16x128xf32>
    %13 = arith.mulf %0, %12 : vector<16x128xf32>
    %14 = arith.addf %13, %0 : vector<16x128xf32>
    %c0_4 = arith.constant 0 : index
    %c0_5 = arith.constant 0 : index
    %15 = vector.load %arg2[%c0_4, %c0_5] : memref<16x128xf32, #tpu.memory_space<vmem>>, vector<16x128xf32>
    tpu.vector_store %arg2[%c0_4, %c0_5], %14 {strides = array<i32>} : memref<16x128xf32, #tpu.memory_space<vmem>>, vector<16x128xf32>,
    return
  }
  func.func @transform_0(%arg0: i32) -> (i32, i32) {
    %c0_i32 = arith.constant 0 : i32
    %c0_i32_0 = arith.constant 0 : i32
    return %arg0, %c0_i32 : i32, i32
  }
  func.func @transform_1(%arg0: i32) -> (i32, i32) {
    %c0_i32 = arith.constant 0 : i32
    %c0_i32_0 = arith.constant 0 : i32
    return %arg0, %c0_i32 : i32, i32
  }
}

</mosaic_0001>

<bundles_post_ra>
// kernel: tpu_custom_call.1
= control target key start
LH: loop header
LB: loop body
LE: loop exit
PB: predicated region body
PF: predicated region fallthrough
CT: control target
= control target key end

     0   :  { %6 = vsyncpa [#allocation3], 0  ;;  %s154_s0 = inlined_call_operand.hbm [shape: f32[16,128], index: 0, kind: input, shape index: {}]   ;;  %s155_s1 = inlined_call_operand.hbm [shape: f32[16,128], index: 1, kind: output, shape index: {}]  }
   0x1   :  { %7 = vsyncpa [#allocation4], 0  ;;  %s12_s8 = sshll.u32 %s154_s0, 4  ;;  %s128_s9 = smov [#allocation2]   ;;  %s13_s8 = int_to_ptr.hbm [resolvable:$true] %s12_s8 }
   0x2   :  { %s14_s10 = sshll.u32 %s128_s9, 4  ;;  %s129_s11 = smov 128   ;;  %s15_s10 = int_to_ptr.vmem [resolvable:$true] %s14_s10 }
   0x3   :  { %s130_s12 = smov 8  }
   0x4   :  { %20 = dma.hbm_to_vmem [thread:$0]  %s13_s8, 256, %s15_s10, [#allocation3], %s129_s11, %s129_s11, %s130_s12  }
   0x5   :  { %124 = dma.done.wait [#allocation3], 256  }
   0x6   :  { %125 = vsyncadd [#allocation3], 4294967040  ;;  %v25_v0 = vld [vmem:[#allocation2] sm:$0xff]  ;;  %v26_v1 = vld [vmem:[#allocation2 + $0x8] sm:$0xff]  ;;  %s131_s0 = smov [#allocation5]   ;;  %s55_s16 = sshll.u32 %s155_s1, 4  ;;  %s56_s16 = int_to_ptr.hbm [resolvable:$true] %s55_s16 }
   0x7   :  { %v27_v2 = vmul.f32 %v25_v0, %v25_v0  ;;  %v28_v3 = vmul.f32 %v26_v1, %v26_v1  ;;  %s53_s13 = sshll.u32 %s131_s0, 4  ;;  %s54_s13 = int_to_ptr.vmem [resolvable:$true] %s53_s13 }
   0x9   :  { %v29_v4 = vmul.f32 %v27_v2, %v25_v0  ;;  %v30_v5 = vmul.f32 %v28_v3, %v26_v1 }
   0xb   :  { %v31_v6 = vmul.f32 0.044715, %v29_v4  ;;  %v32_v7 = vmul.f32 0.044715, %v30_v5 }
   0xd   :  { %v33_v8 = vadd.f32 %v31_v6, %v25_v0  ;;  %v34_v9 = vadd.f32 %v32_v7, %v26_v1 }
   0xf   :  { %v35_v10 = vmul.f32 0.7978846, %v33_v8  ;;  %v36_v11 = vmul.f32 0.7978846, %v34_v9 }
  0x11   :  { %72 = vtanh.f32 %v35_v10 }
  0x12   :  { %74 = vtanh.f32 %v36_v11 }
  0x17   :  { %v73_v12 = vpop.eup %72 }
  0x18   :  { %v75_v13 = vpop.eup %74  ;;  %v39_v14 = vadd.f32 1.0, %v73_v12 }
  0x19   :  { %v40_v15 = vadd.f32 1.0, %v75_v13 }
  0x1a   :  { %v41_v16 = vmul.f32 0.5, %v39_v14 }
  0x1b   :  { %v42_v17 = vmul.f32 0.5, %v40_v15 }
  0x1c   :  { %v43_v18 = vmul.f32 %v41_v16, %v25_v0 }
  0x1d   :  { %v44_v19 = vmul.f32 %v42_v17, %v26_v1 }
  0x1e   :  { %v45_v20 = vadd.f32 %v43_v18, %v25_v0 }
  0x1f   :  { %v46_v21 = vadd.f32 %v44_v19, %v26_v1 }
  0x20   :  { %47 = vst [vmem:[#allocation5] sm:$0xff] %v45_v20 }
  0x21   :  { %48 = vst [vmem:[#allocation5 + $0x8] sm:$0xff] %v46_v21 }
  0x22   :  { %61 = dma.vmem_to_hbm [thread:$0]  %s54_s13, 256, %s56_s16, [#allocation4], %s129_s11, %s129_s11, %s130_s12  }
  0x23   :  { %126 = dma.done.wait [#allocation4], 256  }
  0x24   :  { %127 = vsyncadd [#allocation4], 4294967040 }
  0x25   :  { %66 = vsyncpa [#allocation3], 1 }
  0x26   :  { %67 = vsyncpa [#allocation4], 1 }

</bundles_post_ra>
